<compile_context>
chip_gen: v5e
topology: v5e:2x2
jax: 0.10.0
libtpu: 0.0.40
codegen_flags: <defaults>
</compile_context>

<pallas_src>
import numpy as np
import jax
import jax.numpy as jnp
from jax.experimental import pallas as pl
from jax.experimental.pallas import tpu as pltpu

MAX_LENGTH = 128


# ----------------------------- parameter setup (glue) -----------------------------

def inputs_to_tree_reps(head):
    """Mirror of GCNConv.inputs_to_tree_reps (numpy, one-time setup)."""
    adj = np.zeros((MAX_LENGTH, MAX_LENGTH), dtype=np.float32)
    for i in range(MAX_LENGTH):
        if head[i] == -1:
            break
        adj[i][i] = 1.0
        adj[head[i]][i] = 1.0
    return adj


def build_a_hat_batch(heads):
    """A_hat[b] = D^{-1/2} A[b] D^{-1/2}, elementwise, with a zero-degree guard."""
    a_hats = []
    for head in heads:
        A = inputs_to_tree_reps(head)
        d = A.sum(axis=1)
        d_inv_sqrt = 1.0 / np.sqrt(np.maximum(d, 1.0))  # padded rows (deg 0) -> zero rows
        A_hat = (d_inv_sqrt[:, None] * A) * d_inv_sqrt[None, :]
        a_hats.append(A_hat.astype(np.float32))
    return np.stack(a_hats, axis=0)


# --------------------------------- Pallas kernel ----------------------------------

def gcn_kernel(a_ref, x_ref, w_ref, o_ref):
    # Block shapes (all static):
    #   a_ref: (G, N, N)      bf16   per-step sub-batch of A_hat
    #   x_ref: (G*N, c_in)    f32    per-step sub-batch of X rows (flattened)
    #   w_ref: (c_in, c_out)  f32    shared weight, VMEM-resident
    #   o_ref: (G, N, c_out)  f32
    G, N, c_out = o_ref.shape

    # Hoisted feature transform: ONE (G*N, c_in) @ (c_in, c_out) MXU matmul per
    # grid step; f32 accumulation.  Casts to bf16 happen on the VPU in VMEM
    # (no wrapper astype launch / extra HBM pass).
    h = jnp.dot(x_ref[...].astype(jnp.bfloat16),
                w_ref[...].astype(jnp.bfloat16),
                preferred_element_type=jnp.float32)          # (G*N, c_out) f32
    hb = h.astype(jnp.bfloat16)                              # single MXU-feed requant

    # Per-graph neighborhood aggregation, unrolled over the static sub-batch.
    for g in range(G):
        out = jnp.dot(a_ref[g], hb[g * N:(g + 1) * N],
                      preferred_element_type=jnp.float32)    # (N, c_out) f32
        # relu in f32 on the VPU; store the real c_out channels directly
        # (no padded writeback + wrapper slice).
        o_ref[g] = jnp.maximum(out, 0.0).astype(o_ref.dtype)


def gcn_conv_forward(a_hat_bf16, x, w):
    """relu(A_hat[b] @ X[b] @ W) for all graphs b in a single pallas_call.

    a_hat_bf16: (B, N, N) bfloat16 — precomputed at init (like the torch buffer).
    x:          (B, N, c_in) float32.
    w:          (c_in, c_out) float32.
    """
    B, N, _ = a_hat_bf16.shape
    c_in = x.shape[-1]
    c_out = w.shape[-1]
    assert N == MAX_LENGTH and x.shape == (B, N, c_in) and w.shape == (c_in, c_out)

    # G graphs per step amortizes the per-step prologue; keep exactly 2
    # "parallel" steps so both v7x TensorCores get work.
    G = B // 2 if B >= 2 else 1
    assert B % G == 0
    steps = B // G

    # Free bitcast-reshape (row-major, fused under jit): lets the kernel run one
    # (G*N, c_in) matmul per step instead of G small 128-row ones.
    x_flat = x.reshape(B * N, c_in)

    flops = 2 * B * (N * c_in * c_out + N * N * c_out)
    bytes_accessed = (a_hat_bf16.size * a_hat_bf16.dtype.itemsize
                      + x.size * x.dtype.itemsize
                      + w.size * w.dtype.itemsize
                      + B * N * c_out * 4)

    return pl.pallas_call(
        gcn_kernel,
        out_shape=jax.ShapeDtypeStruct((B, N, c_out), jnp.float32),
        grid=(steps,),
        in_specs=[
            pl.BlockSpec((G, N, N), lambda b: (b, 0, 0)),       # sub-batch A_hat (bf16)
            pl.BlockSpec((G * N, c_in), lambda b: (b, 0)),      # sub-batch X rows (f32)
            pl.BlockSpec((c_in, c_out), lambda b: (0, 0)),      # shared W, VMEM-resident
        ],
        out_specs=pl.BlockSpec((G, N, c_out), lambda b: (b, 0, 0)),
        compiler_params=pltpu.CompilerParams(
            dimension_semantics=("parallel",),
            vmem_limit_bytes=4 * 1024 * 1024),
        cost_estimate=pl.CostEstimate(
            flops=flops, transcendentals=0, bytes_accessed=bytes_accessed),
    )(a_hat_bf16, x_flat, w)


# ------------------------------------- main ---------------------------------------

if __name__ == "__main__":
    B = 8
    in_channels = 32
    out_channels = 32

    # Deterministic synthetic dependency heads: chains of varying length, padded
    # with -1 past each graph's length (exercises the zero-degree guard).
    lengths = [128, 112, 96, 80, 64, 48, 32, 128]
    heads = []
    for L in lengths[:B]:
        h = np.full((MAX_LENGTH,), -1, dtype=np.int64)
        h[:L] = np.maximum(np.arange(L) - 1, 0)
        heads.append(h)

    a_hat_np = build_a_hat_batch(heads)                     # (B, 128, 128) f32 numpy

    key = jax.random.PRNGKey(0)
    kx, kw = jax.random.split(key)
    X = jax.random.normal(kx, (B, MAX_LENGTH, in_channels), dtype=jnp.float32)
    # nn.Parameter(torch.rand(in, out)) -> uniform [0, 1)
    W = jax.random.uniform(kw, (in_channels, out_channels), dtype=jnp.float32)

    # Init-time conversions (module __init__ equivalent) — not in the forward path.
    A_hat_f32 = jnp.asarray(a_hat_np)                       # reference only
    A_hat_bf16 = A_hat_f32.astype(jnp.bfloat16)             # kernel buffer

    forward = jax.jit(gcn_conv_forward)
    out = forward(A_hat_bf16, X, W)
    out = jax.block_until_ready(out)
    assert out.shape == (B, MAX_LENGTH, out_channels)

    # (1) Tight check vs. a reference that applies the same bf16 feeds / ordering.
    h_ref = jnp.einsum("bnc,ck->bnk",
                       X.astype(jnp.bfloat16), W.astype(jnp.bfloat16),
                       preferred_element_type=jnp.float32).astype(jnp.bfloat16)
    ref_bf = jnp.maximum(
        jnp.einsum("bnm,bmk->bnk", A_hat_bf16, h_ref,
                   preferred_element_type=jnp.float32), 0.0)
    np.testing.assert_allclose(np.asarray(out), np.asarray(ref_bf),
                               rtol=1e-2, atol=1e-2)

    # (2) Sanity check vs. the full-f32 module semantics: relu((A_hat @ X) @ W).
    ref_f32 = jnp.maximum(jnp.einsum("bnm,bmc->bnc", A_hat_f32, X) @ W, 0.0)
    np.testing.assert_allclose(np.asarray(out), np.asarray(ref_f32),
                               rtol=5e-2, atol=1e-1)

    print("KERNEL_OK")
</pallas_src>

<mosaic_0001>
module attributes {stable_mosaic.version = 11 : i64} {
  func.func @gcn_kernel(%arg0: i32, %arg1: memref<4x128x128xbf16, #tpu.memory_space<vmem>>, %arg2: memref<512x32xf32, #tpu.memory_space<vmem>>, %arg3: memref<32x32xf32, #tpu.memory_space<vmem>>, %arg4: memref<4x128x32xf32, #tpu.memory_space<vmem>>) attributes {dimension_semantics = [#tpu.dimension_semantics<parallel>], iteration_bounds = array<i64: 2>, scalar_prefetch = 0 : i64, scratch_operands = 0 : i64, tpu.core_type = #tpu.core_type<tc>, window_params = [{transform_indices = @transform_0, window_bounds = array<i64: 4, 128, 128>}, {transform_indices = @transform_1, window_bounds = array<i64: 512, 32>}, {pipeline_mode = #tpu.pipeline_mode<synchronous>, transform_indices = @transform_2, window_bounds = array<i64: 32, 32>}, {transform_indices = @transform_3, window_bounds = array<i64: 4, 128, 32>}]} {
    %c0 = arith.constant 0 : index
    %c0_0 = arith.constant 0 : index
    %0 = vector.load %arg2[%c0, %c0_0] : memref<512x32xf32, #tpu.memory_space<vmem>>, vector<512x32xf32>
    %1 = arith.truncf %0 : vector<512x32xf32> to vector<512x32xbf16>
    %c0_1 = arith.constant 0 : index
    %c0_2 = arith.constant 0 : index
    %2 = vector.load %arg3[%c0_1, %c0_2] : memref<32x32xf32, #tpu.memory_space<vmem>>, vector<32x32xf32>
    %3 = arith.truncf %2 : vector<32x32xf32> to vector<32x32xbf16>
    %cst = arith.constant dense<0.000000e+00> : vector<512x32xf32>
    %4 = tpu.matmul %1, %3, %cst {dimension_numbers = #tpu.dot_dimension_numbers<[1], [0], [0], [1], [0, 0, 1, 1], [], []>} : vector<512x32xbf16>, vector<32x32xbf16>, vector<512x32xf32> -> vector<512x32xf32>
    %5 = arith.truncf %4 : vector<512x32xf32> to vector<512x32xbf16>
    %c0_3 = arith.constant 0 : index
    %c0_4 = arith.constant 0 : index
    %c0_5 = arith.constant 0 : index
    %6 = vector.load %arg1[%c0_3, %c0_4, %c0_5] : memref<4x128x128xbf16, #tpu.memory_space<vmem>>, vector<1x128x128xbf16>
    %7 = vector.shape_cast %6 : vector<1x128x128xbf16> to vector<128x128xbf16>
    %8 = vector.extract_strided_slice %5 {offsets = [0, 0], sizes = [128, 32], strides = [1, 1]} : vector<512x32xbf16> to vector<128x32xbf16>
    %cst_6 = arith.constant dense<0.000000e+00> : vector<128x32xf32>
    %9 = tpu.matmul %7, %8, %cst_6 {dimension_numbers = #tpu.dot_dimension_numbers<[1], [0], [0], [1], [0, 0, 1, 1], [], []>} : vector<128x128xbf16>, vector<128x32xbf16>, vector<128x32xf32> -> vector<128x32xf32>
    %cst_7 = arith.constant 0.000000e+00 : f32
    %10 = vector.broadcast %cst_7 : f32 to vector<128x32xf32>
    %11 = arith.maximumf %9, %10 : vector<128x32xf32>
    %c0_8 = arith.constant 0 : index
    %c0_9 = arith.constant 0 : index
    %c0_10 = arith.constant 0 : index
    %12 = vector.load %arg4[%c0_8, %c0_9, %c0_10] : memref<4x128x32xf32, #tpu.memory_space<vmem>>, vector<1x128x32xf32>
    %13 = vector.shape_cast %12 : vector<1x128x32xf32> to vector<128x32xf32>
    %14 = vector.shape_cast %11 : vector<128x32xf32> to vector<1x128x32xf32>
    tpu.vector_store %arg4[%c0_8, %c0_9, %c0_10], %14 {strides = array<i32>} : memref<4x128x32xf32, #tpu.memory_space<vmem>>, vector<1x128x32xf32>,
    %c1 = arith.constant 1 : index
    %c0_11 = arith.constant 0 : index
    %c0_12 = arith.constant 0 : index
    %15 = vector.load %arg1[%c1, %c0_11, %c0_12] : memref<4x128x128xbf16, #tpu.memory_space<vmem>>, vector<1x128x128xbf16>
    %16 = vector.shape_cast %15 : vector<1x128x128xbf16> to vector<128x128xbf16>
    %17 = vector.extract_strided_slice %5 {offsets = [128, 0], sizes = [128, 32], strides = [1, 1]} : vector<512x32xbf16> to vector<128x32xbf16>
    %cst_13 = arith.constant dense<0.000000e+00> : vector<128x32xf32>
    %18 = tpu.matmul %16, %17, %cst_13 {dimension_numbers = #tpu.dot_dimension_numbers<[1], [0], [0], [1], [0, 0, 1, 1], [], []>} : vector<128x128xbf16>, vector<128x32xbf16>, vector<128x32xf32> -> vector<128x32xf32>
    %cst_14 = arith.constant 0.000000e+00 : f32
    %19 = vector.broadcast %cst_14 : f32 to vector<128x32xf32>
    %20 = arith.maximumf %18, %19 : vector<128x32xf32>
    %c1_15 = arith.constant 1 : index
    %c0_16 = arith.constant 0 : index
    %c0_17 = arith.constant 0 : index
    %21 = vector.load %arg4[%c1_15, %c0_16, %c0_17] : memref<4x128x32xf32, #tpu.memory_space<vmem>>, vector<1x128x32xf32>
    %22 = vector.shape_cast %21 : vector<1x128x32xf32> to vector<128x32xf32>
    %23 = vector.shape_cast %20 : vector<128x32xf32> to vector<1x128x32xf32>
    tpu.vector_store %arg4[%c1_15, %c0_16, %c0_17], %23 {strides = array<i32>} : memref<4x128x32xf32, #tpu.memory_space<vmem>>, vector<1x128x32xf32>,
    %c2 = arith.constant 2 : index
    %c0_18 = arith.constant 0 : index
    %c0_19 = arith.constant 0 : index
    %24 = vector.load %arg1[%c2, %c0_18, %c0_19] : memref<4x128x128xbf16, #tpu.memory_space<vmem>>, vector<1x128x128xbf16>
    %25 = vector.shape_cast %24 : vector<1x128x128xbf16> to vector<128x128xbf16>
    %26 = vector.extract_strided_slice %5 {offsets = [256, 0], sizes = [128, 32], strides = [1, 1]} : vector<512x32xbf16> to vector<128x32xbf16>
    %cst_20 = arith.constant dense<0.000000e+00> : vector<128x32xf32>
    %27 = tpu.matmul %25, %26, %cst_20 {dimension_numbers = #tpu.dot_dimension_numbers<[1], [0], [0], [1], [0, 0, 1, 1], [], []>} : vector<128x128xbf16>, vector<128x32xbf16>, vector<128x32xf32> -> vector<128x32xf32>
    %cst_21 = arith.constant 0.000000e+00 : f32
    %28 = vector.broadcast %cst_21 : f32 to vector<128x32xf32>
    %29 = arith.maximumf %27, %28 : vector<128x32xf32>
    %c2_22 = arith.constant 2 : index
    %c0_23 = arith.constant 0 : index
    %c0_24 = arith.constant 0 : index
    %30 = vector.load %arg4[%c2_22, %c0_23, %c0_24] : memref<4x128x32xf32, #tpu.memory_space<vmem>>, vector<1x128x32xf32>
    %31 = vector.shape_cast %30 : vector<1x128x32xf32> to vector<128x32xf32>
    %32 = vector.shape_cast %29 : vector<128x32xf32> to vector<1x128x32xf32>
    tpu.vector_store %arg4[%c2_22, %c0_23, %c0_24], %32 {strides = array<i32>} : memref<4x128x32xf32, #tpu.memory_space<vmem>>, vector<1x128x32xf32>,
    %c3 = arith.constant 3 : index
    %c0_25 = arith.constant 0 : index
    %c0_26 = arith.constant 0 : index
    %33 = vector.load %arg1[%c3, %c0_25, %c0_26] : memref<4x128x128xbf16, #tpu.memory_space<vmem>>, vector<1x128x128xbf16>
    %34 = vector.shape_cast %33 : vector<1x128x128xbf16> to vector<128x128xbf16>
    %35 = vector.extract_strided_slice %5 {offsets = [384, 0], sizes = [128, 32], strides = [1, 1]} : vector<512x32xbf16> to vector<128x32xbf16>
    %cst_27 = arith.constant dense<0.000000e+00> : vector<128x32xf32>
    %36 = tpu.matmul %34, %35, %cst_27 {dimension_numbers = #tpu.dot_dimension_numbers<[1], [0], [0], [1], [0, 0, 1, 1], [], []>} : vector<128x128xbf16>, vector<128x32xbf16>, vector<128x32xf32> -> vector<128x32xf32>
    %cst_28 = arith.constant 0.000000e+00 : f32
    %37 = vector.broadcast %cst_28 : f32 to vector<128x32xf32>
    %38 = arith.maximumf %36, %37 : vector<128x32xf32>
    %c3_29 = arith.constant 3 : index
    %c0_30 = arith.constant 0 : index
    %c0_31 = arith.constant 0 : index
    %39 = vector.load %arg4[%c3_29, %c0_30, %c0_31] : memref<4x128x32xf32, #tpu.memory_space<vmem>>, vector<1x128x32xf32>
    %40 = vector.shape_cast %39 : vector<1x128x32xf32> to vector<128x32xf32>
    %41 = vector.shape_cast %38 : vector<128x32xf32> to vector<1x128x32xf32>
    tpu.vector_store %arg4[%c3_29, %c0_30, %c0_31], %41 {strides = array<i32>} : memref<4x128x32xf32, #tpu.memory_space<vmem>>, vector<1x128x32xf32>,
    return
  }
  func.func @transform_0(%arg0: i32) -> (i32, i32, i32) {
    %c0_i32 = arith.constant 0 : i32
    %c0_i32_0 = arith.constant 0 : i32
    %c0_i32_1 = arith.constant 0 : i32
    return %arg0, %c0_i32, %c0_i32_0 : i32, i32, i32
  }
  func.func @transform_1(%arg0: i32) -> (i32, i32) {
    %c0_i32 = arith.constant 0 : i32
    %c0_i32_0 = arith.constant 0 : i32
    return %arg0, %c0_i32 : i32, i32
  }
  func.func @transform_2(%arg0: i32) -> (i32, i32) {
    %c0_i32 = arith.constant 0 : i32
    %c0_i32_0 = arith.constant 0 : i32
    %c0_i32_1 = arith.constant 0 : i32
    return %c0_i32, %c0_i32_0 : i32, i32
  }
  func.func @transform_3(%arg0: i32) -> (i32, i32, i32) {
    %c0_i32 = arith.constant 0 : i32
    %c0_i32_0 = arith.constant 0 : i32
    %c0_i32_1 = arith.constant 0 : i32
    return %arg0, %c0_i32, %c0_i32_0 : i32, i32, i32
  }
}

</mosaic_0001>

<bundles_post_ra>
// kernel: gcn_conv_forward.1
= control target key start
LH: loop header
LB: loop body
LE: loop exit
PB: predicated region body
PF: predicated region fallthrough
CT: control target
= control target key end

     0   :  { %s1833_s12 = smov 0   ;;  %s2380_s0 = inlined_call_operand.vmem [shape: bf16[8,128,128], index: 0, kind: input, shape index: {}]   ;;  %s2381_s1 = inlined_call_operand.vmem [shape: f32[1024,32], index: 1, kind: input, shape index: {}]   ;;  %s2382_s2 = inlined_call_operand.vmem [shape: f32[32,32], index: 2, kind: input, shape index: {}]   ;;  %s2383_s3 = inlined_call_operand.vmem [shape: f32[8,128,32], index: 3, kind: output, shape index: {}]  }
   0x1 LB: > { %s1482_s13 = sadd.s32 4294967295, %s1811_s12   ;;  %p1486_p0 = scmp.ge.s32.totalorder %s1811_s12, 1  ;;  %s1811_s12 = sphi %s1833_s12, %s13_s12  }
   0x2   : > { %p150_p1 = scmp.lt.s32.totalorder %s1811_s12, 3 }
   0x4   : > { %p151_p2 = pnand %p1486_p0, %p150_p1 }
   0x5   : > { %s1490_s20 = sshll.u32 (!%p151_p2), %s1482_s13, 6  ;;  %s1487_s27 = sshll.u32 (!%p151_p2), %s1482_s13, 2 }
   0x6   : > { %154 = sbr.rel (%p151_p2) target bundleno = 799 (0x31f), region = 32  ;;  %p189_p3 = scmp.lt.s32.totalorder (!%p151_p2), %s1490_s20, 127 }
   0x7   : > { %p182_p4 = scmp.lt.s32.totalorder (!%p151_p2), %s1487_s27, 7 }
   0xb   : > { %v300_v0 = vld [vmem:[%s2382_s2 + $0x10] sm:$0xff]  ;;  %v301_v1 = vld [vmem:[%s2382_s2 + $0x18] sm:$0xff]  ;;  %v298_v2 = vld [vmem:[%s2382_s2] sm:$0xff]  ;;  %s2385_s20 = smov (!%p189_p3, %s1490_s20), 127  ;;  %vm304_vm0 = vcmask 261120   ;;  %s2387_s27 = smov (!%p182_p4, %s1487_s27), 7 }
   0xc   : > { %v303_v3 = vpack.c.bf16 %v301_v1, %v300_v0  ;;  %v299_v4 = vld [vmem:[%s2382_s2 + $0x8] sm:$0xff]  ;;  %s1491_s23 = sshll.u32 %s2385_s20, 3  ;;  %s1753_s28 = sshll.u32 %s2387_s27, 6 }
   0xd   : > { %v302_v5 = vpack.c.bf16 %v299_v4, %v298_v2  ;;  %s1858_s26 = scalar_lea.vmem %s2381_s1, %s1491_s23  ;;  %s2162_s4 = scalar_lea.vmem %s2380_s0, %s1753_s28 }
   0xe   : > { %407 = vmatpush.bf16.msra.mxu0 %v303_v3  ;;  %1787 = vmatpush.bf16.msra.mxu2 %v303_v3  ;;  %v202_v6 = vld [vmem:[%s1858_s26] sm:$0xff]  ;;  %v203_v7 = vld [vmem:[%s1858_s26 + $0x8] sm:$0xff]  ;;  %v236_v8 = vld [vmem:[%s1858_s26 + $0x110] sm:$0xff]  ;;  %s1754_s5 = sshll.u32 %s2387_s27, 7 }
   0xf   : > { %v266_v9 = vpack.c.bf16 %v203_v7, %v202_v6  ;;  %v237_v10 = vld [vmem:[%s1858_s26 + $0x118] sm:$0xff]  ;;  %v204_v12 = vld [vmem:[%s1858_s26 + $0x10] sm:$0xff]  ;;  %v238_v14 = vld [vmem:[%s1858_s26 + $0x120] sm:$0xff]  ;;  %s2230_s8 = scalar_lea.vmem %s2383_s3, %s1754_s5 }
  0x10   : > { %v283_v11 = vpack.c.bf16 %v237_v10, %v236_v8  ;;  %v205_v13 = vld [vmem:[%s1858_s26 + $0x18] sm:$0xff]  ;;  %v239_v15 = vld [vmem:[%s1858_s26 + $0x128] sm:$0xff]  ;;  %v206_v18 = vld [vmem:[%s1858_s26 + $0x20] sm:$0xff] }
  0x11   : > { %v267_v16 = vpack.c.bf16 %v205_v13, %v204_v12  ;;  %v284_v17 = vpack.c.bf16 %v239_v15, %v238_v14  ;;  %v207_v19 = vld [vmem:[%s1858_s26 + $0x28] sm:$0xff]  ;;  %v240_v20 = vld [vmem:[%s1858_s26 + $0x130] sm:$0xff]  ;;  %v241_v21 = vld [vmem:[%s1858_s26 + $0x138] sm:$0xff] }
  0x12   : > { %408 = vmatpush.bf16.msra.mxu0 %v302_v5  ;;  %1788 = vmatpush.bf16.msra.mxu2 %v302_v5  ;;  %v268_v22 = vpack.c.bf16 %v207_v19, %v206_v18  ;;  %v285_v23 = vpack.c.bf16 %v241_v21, %v240_v20  ;;  %v208_v24 = vld [vmem:[%s1858_s26 + $0x30] sm:$0xff]  ;;  %v209_v25 = vld [vmem:[%s1858_s26 + $0x38] sm:$0xff]  ;;  %v242_v26 = vld [vmem:[%s1858_s26 + $0x140] sm:$0xff] }
  0x13   : > { %v243_v27 = vld [vmem:[%s1858_s26 + $0x148] sm:$0xff]  ;;  %v269_v28 = vpack.c.bf16 %v209_v25, %v208_v24  ;;  %v210_v30 = vld [vmem:[%s1858_s26 + $0x40] sm:$0xff]  ;;  %v244_v32 = vld [vmem:[%s1858_s26 + $0x150] sm:$0xff] }
  0x14   : > { %v286_v29 = vpack.c.bf16 %v243_v27, %v242_v26  ;;  %v211_v31 = vld [vmem:[%s1858_s26 + $0x48] sm:$0xff]  ;;  %v245_v33 = vld [vmem:[%s1858_s26 + $0x158] sm:$0xff]  ;;  %v212_v36 = vld [vmem:[%s1858_s26 + $0x50] sm:$0xff] }
  0x15   : > { %1495 = vmatmul.msk.bf16.vlgmr.msra.gmra.mxu0 %vm304_vm0, %v266_v9  ;;  %1512 = vmatmul.msk.bf16.vlgmr.msra.gmra.mxu2 %vm304_vm0, %v283_v11  ;;  %v270_v34 = vpack.c.bf16 %v211_v31, %v210_v30  ;;  %v287_v35 = vpack.c.bf16 %v245_v33, %v244_v32  ;;  %v213_v37 = vld [vmem:[%s1858_s26 + $0x58] sm:$0xff]  ;;  %v246_v38 = vld [vmem:[%s1858_s26 + $0x160] sm:$0xff]  ;;  %v247_v39 = vld [vmem:[%s1858_s26 + $0x168] sm:$0xff] }
  0x16   : > { %v271_v40 = vpack.c.bf16 %v213_v37, %v212_v36  ;;  %v288_v41 = vpack.c.bf16 %v247_v39, %v246_v38  ;;  %v214_v42 = vld [vmem:[%s1858_s26 + $0x60] sm:$0xff]  ;;  %v215_v43 = vld [vmem:[%s1858_s26 + $0x68] sm:$0xff]  ;;  %v248_v44 = vld [vmem:[%s1858_s26 + $0x170] sm:$0xff] }
  0x17   : > { %v249_v45 = vld [vmem:[%s1858_s26 + $0x178] sm:$0xff]  ;;  %v272_v46 = vpack.c.bf16 %v215_v43, %v214_v42  ;;  %v216_v48 = vld [vmem:[%s1858_s26 + $0x70] sm:$0xff]  ;;  %v250_v50 = vld [vmem:[%s1858_s26 + $0x180] sm:$0xff] }
  0x18   : > { %v289_v47 = vpack.c.bf16 %v249_v45, %v248_v44  ;;  %v217_v49 = vld [vmem:[%s1858_s26 + $0x78] sm:$0xff]  ;;  %v251_v51 = vld [vmem:[%s1858_s26 + $0x188] sm:$0xff]  ;;  %v218_v54 = vld [vmem:[%s1858_s26 + $0x80] sm:$0xff] }
  0x19   : > { %v273_v52 = vpack.c.bf16 %v217_v49, %v216_v48  ;;  %v290_v53 = vpack.c.bf16 %v251_v51, %v250_v50  ;;  %v219_v55 = vld [vmem:[%s1858_s26 + $0x88] sm:$0xff]  ;;  %v252_v56 = vld [vmem:[%s1858_s26 + $0x190] sm:$0xff]  ;;  %v253_v57 = vld [vmem:[%s1858_s26 + $0x198] sm:$0xff] }
  0x1a   : > { %v274_v58 = vpack.c.bf16 %v219_v55, %v218_v54  ;;  %v291_v60 = vpack.c.bf16 %v253_v57, %v252_v56  ;;  %v220_v3 = vld [vmem:[%s1858_s26 + $0x90] sm:$0xff]  ;;  %v221_v4 = vld [vmem:[%s1858_s26 + $0x98] sm:$0xff]  ;;  %v254_v5 = vld [vmem:[%s1858_s26 + $0x1a0] sm:$0xff] }
  0x1b   : > { %v255_v6 = vld [vmem:[%s1858_s26 + $0x1a8] sm:$0xff]  ;;  %v275_v9 = vpack.c.bf16 %v221_v4, %v220_v3  ;;  %v222_v18 = vld [vmem:[%s1858_s26 + $0xa0] sm:$0xff]  ;;  %v256_v20 = vld [vmem:[%s1858_s26 + $0x1b0] sm:$0xff] }
  0x1c   : > { %v292_v11 = vpack.c.bf16 %v255_v6, %v254_v5  ;;  %v223_v19 = vld [vmem:[%s1858_s26 + $0xa8] sm:$0xff]  ;;  %v257_v21 = vld [vmem:[%s1858_s26 + $0x1b8] sm:$0xff]  ;;  %v224_v33 = vld [vmem:[%s1858_s26 + $0xb0] sm:$0xff] }
  0x1d   : > { %v276_v24 = vpack.c.bf16 %v223_v19, %v222_v18  ;;  %v293_v26 = vpack.c.bf16 %v257_v21, %v256_v20  ;;  %v259_v36 = vld [vmem:[%s1858_s26 + $0x1c8] sm:$0xff]  ;;  %v226_v48 = vld [vmem:[%s1858_s26 + $0xc0] sm:$0xff]  ;;  %v260_v50 = vld [vmem:[%s1858_s26 + $0x1d0] sm:$0xff] }
  0x1e   : > { %v227_v49 = vld [vmem:[%s1858_s26 + $0xc8] sm:$0xff]  ;;  %v261_v51 = vld [vmem:[%s1858_s26 + $0x1d8] sm:$0xff] }
  0x1f   : > { %v278_v54 = vpack.c.bf16 %v227_v49, %v226_v48  ;;  %v295_v56 = vpack.c.bf16 %v261_v51, %v260_v50 }
  0x25   : > { %1496 = vmatmul.msk.bf16.gmra.mxu0 %vm304_vm0, %v267_v16  ;;  %1513 = vmatmul.msk.bf16.gmra.mxu2 %vm304_vm0, %v284_v17 }
  0x35   : > { %1497 = vmatmul.msk.bf16.gmra.mxu0 %vm304_vm0, %v268_v22  ;;  %1514 = vmatmul.msk.bf16.gmra.mxu2 %vm304_vm0, %v285_v23 }
  0x45   : > { %1498 = vmatmul.msk.bf16.gmra.mxu0 %vm304_vm0, %v269_v28  ;;  %1515 = vmatmul.msk.bf16.gmra.mxu2 %vm304_vm0, %v286_v29 }
  0x55   : > { %1499 = vmatmul.msk.bf16.gmra.mxu0 %vm304_vm0, %v270_v34  ;;  %1516 = vmatmul.msk.bf16.gmra.mxu2 %vm304_vm0, %v287_v35  ;;  %v225_v34 = vld [vmem:[%s1858_s26 + $0xb8] sm:$0xff]  ;;  %v258_v35 = vld [vmem:[%s1858_s26 + $0x1c0] sm:$0xff] }
  0x56   : > { %v277_v39 = vpack.c.bf16 %v225_v34, %v224_v33  ;;  %v233_v33 = vld [vmem:[%s1858_s26 + $0xf8] sm:$0xff] }
  0x65   : > { %1500 = vmatmul.msk.bf16.gmra.mxu0 %vm304_vm0, %v271_v40  ;;  %1517 = vmatmul.msk.bf16.gmra.mxu2 %vm304_vm0, %v288_v41  ;;  %v294_v41 = vpack.c.bf16 %v259_v36, %v258_v35 }
  0x75   : > { %1501 = vmatmul.msk.bf16.gmra.mxu0 %vm304_vm0, %v272_v46  ;;  %1518 = vmatmul.msk.bf16.gmra.mxu2 %vm304_vm0, %v289_v47 }
  0x85   : > { %1502 = vmatmul.msk.bf16.gmra.mxu0 %vm304_vm0, %v273_v52  ;;  %1519 = vmatmul.msk.bf16.gmra.mxu2 %vm304_vm0, %v290_v53 }
  0x92   : > { %v410_v59 = vpop.f32.mrf.mxu0 }
  0x93   : > { %v570_v61 = vpack.c.bf16 %v410_v59, %v410_v59  ;;  %v228_v59 = vld [vmem:[%s1858_s26 + $0xd0] sm:$0xff] }
  0x95   : > { %1503 = vmatmul.msk.bf16.gmra.mxu0 %vm304_vm0, %v274_v58  ;;  %1520 = vmatmul.msk.bf16.gmra.mxu2 %vm304_vm0, %v291_v60  ;;  %v1916_v1 = vunpack.c.l.b16 %v570_v61  ;;  %v229_v60 = vld [vmem:[%s1858_s26 + $0xd8] sm:$0xff]  ;;  %v262_v61 = vld [vmem:[%s1858_s26 + $0x1e0] sm:$0xff] }
  0x96   : > { %v279_v3 = vpack.c.bf16 %v229_v60, %v228_v59 }
  0x98   : > { %v1914_v62 = vpop.f32.mrf.mxu2 }
  0x99   : > { %v604_v21 = vpack.c.bf16 %v1914_v62, %v1914_v62 }
  0x9a   : > { %v412_v63 = vpop.f32.mrf.mxu0 }
  0x9b   : > { %v571_v0 = vpack.c.bf16 %v412_v63, %v412_v63  ;;  %v263_v63 = vld [vmem:[%s1858_s26 + $0x1e8] sm:$0xff] }
  0x9c   : > { %v296_v5 = vpack.c.bf16 %v263_v63, %v262_v61 }
  0x9d   : > { %v1918_v2 = vunpack.c.l.b16 %v571_v0 }
  0x9f   : > { %v730_v7 = vpack.c.b16 %v1918_v2, %v1916_v1 }
  0xa0   : > { %v1926_v8 = vpop.f32.mrf.mxu2 }
  0xa2   : > { %v415_v10 = vpop.f32.mrf.mxu0 }
  0xa3   : > { %v572_v12 = vpack.c.bf16 %v415_v10, %v415_v10  ;;  %v230_v10 = vld [vmem:[%s1858_s26 + $0xe0] sm:$0xff] }
  0xa5   : > { %1504 = vmatmul.msk.bf16.gmra.mxu0 %vm304_vm0, %v275_v9  ;;  %1521 = vmatmul.msk.bf16.gmra.mxu2 %vm304_vm0, %v292_v11  ;;  %v1932_v16 = vunpack.c.l.b16 %v572_v12  ;;  %v231_v11 = vld [vmem:[%s1858_s26 + $0xe8] sm:$0xff]  ;;  %v264_v12 = vld [vmem:[%s1858_s26 + $0x1f0] sm:$0xff] }
  0xa6   : > { %v280_v18 = vpack.c.bf16 %v231_v11, %v230_v10 }
  0xa8   : > { %v1930_v13 = vpop.f32.mrf.mxu2 }
  0xa9   : > { %v606_v62 = vpack.c.bf16 %v1930_v13, %v1930_v13 }
  0xaa   : > { %v417_v14 = vpop.f32.mrf.mxu0 }
  0xab   : > { %v573_v15 = vpack.c.bf16 %v417_v14, %v417_v14  ;;  %v265_v14 = vld [vmem:[%s1858_s26 + $0x1f8] sm:$0xff] }
  0xac   : > { %v297_v20 = vpack.c.bf16 %v265_v14, %v264_v12 }
  0xad   : > { %v1934_v17 = vunpack.c.l.b16 %v573_v15 }
  0xaf   : > { %v731_v22 = vpack.c.b16 %v1934_v17, %v1932_v16 }
  0xb0   : > { %v1942_v23 = vpop.f32.mrf.mxu2 }
  0xb2   : > { %v420_v25 = vpop.f32.mrf.mxu0 }
  0xb3   : > { %v574_v27 = vpack.c.bf16 %v420_v25, %v420_v25 }
  0xb5   : > { %1505 = vmatmul.msk.bf16.gmra.mxu0 %vm304_vm0, %v276_v24  ;;  %1522 = vmatmul.msk.bf16.gmra.mxu2 %vm304_vm0, %v293_v26  ;;  %v1948_v31 = vunpack.c.l.b16 %v574_v27  ;;  %v605_v24 = vpack.c.bf16 %v1926_v8, %v1926_v8  ;;  %v2008_v27 = vunpack.c.l.b16 %v604_v21  ;;  %v607_v8 = vpack.c.bf16 %v1942_v23, %v1942_v23 }
  0xb8   : > { %v1946_v28 = vpop.f32.mrf.mxu2 }
  0xb9   : > { %v608_v14 = vpack.c.bf16 %v1946_v28, %v1946_v28 }
  0xba   : > { %v422_v29 = vpop.f32.mrf.mxu0 }
  0xbb   : > { %v575_v30 = vpack.c.bf16 %v422_v29, %v422_v29  ;;  %v2010_v29 = vunpack.c.l.b16 %v605_v24 }
  0xbd   : > { %v1950_v32 = vunpack.c.l.b16 %v575_v30  ;;  %v232_v30 = vld [vmem:[%s1858_s26 + $0xf0] sm:$0xff]  ;;  %v1120_v34 = vpack.c.b16 %v2010_v29, %v2008_v27 }
  0xbe   : > { %v281_v36 = vpack.c.bf16 %v233_v33, %v232_v30 }
  0xbf   : > { %v732_v37 = vpack.c.b16 %v1950_v32, %v1948_v31 }
  0xc0   : > { %v1958_v38 = vpop.f32.mrf.mxu2 }
  0xc2   : > { %v425_v40 = vpop.f32.mrf.mxu0 }
  0xc3   : > { %v576_v42 = vpack.c.bf16 %v425_v40, %v425_v40 }
  0xc5   : > { %1506 = vmatmul.msk.bf16.gmra.mxu0 %vm304_vm0, %v277_v39  ;;  %1523 = vmatmul.msk.bf16.gmra.mxu2 %vm304_vm0, %v294_v41  ;;  %v1964_v46 = vunpack.c.l.b16 %v576_v42 }
  0xc8   : > { %v1962_v43 = vpop.f32.mrf.mxu2 }
  0xca   : > { %v427_v44 = vpop.f32.mrf.mxu0 }
  0xcb   : > { %v577_v45 = vpack.c.bf16 %v427_v44, %v427_v44  ;;  %v2025_v44 = vunpack.c.l.b16 %v606_v62 }
  0xcd   : > { %v1966_v47 = vunpack.c.l.b16 %v577_v45  ;;  %v2027_v45 = vunpack.c.l.b16 %v607_v8 }
  0xcf   : > { %v733_v52 = vpack.c.b16 %v1966_v47, %v1964_v46  ;;  %v1121_v13 = vpack.c.b16 %v2027_v45, %v2025_v44 }
  0xd0   : > { %v1974_v53 = vpop.f32.mrf.mxu2 }
  0xd2   : > { %v1976_v55 = vpop.f32.mrf.mxu0 }
  0xd3   : > { %v578_v12 = vpack.c.bf16 %v1976_v55, %v1976_v55 }
  0xd5   : > { %1507 = vmatmul.msk.bf16.gmra.mxu0 %vm304_vm0, %v278_v54  ;;  %1524 = vmatmul.msk.bf16.gmra.mxu2 %vm304_vm0, %v295_v56 }
  0xd8   : > { %v1980_v57 = vpop.f32.mrf.mxu2 }
  0xd9   : > { %v612_v32 = vpack.c.bf16 %v1980_v57, %v1980_v57 }
  0xda   : > { %v1982_v58 = vpop.f32.mrf.mxu0 }
  0xe0   : > { %v1988_v0 = vpop.f32.mrf.mxu2 }
  0xe1   : > { %v613_v16 = vpack.c.bf16 %v1988_v0, %v1988_v0 }
  0xe2   : > { %v435_v4 = vpop.f32.mrf.mxu0 }
  0xe3   : > { %v580_v23 = vpack.c.bf16 %v435_v4, %v435_v4  ;;  %v609_v4 = vpack.c.bf16 %v1958_v38, %v1958_v38 }
  0xe5   : > { %1508 = vmatmul.msk.bf16.gmra.mxu0 %vm304_vm0, %v279_v3  ;;  %1525 = vmatmul.msk.bf16.gmra.mxu2 %vm304_vm0, %v296_v5  ;;  %v579_v5 = vpack.c.bf16 %v1982_v58, %v1982_v58  ;;  %v2045_v30 = vunpack.c.l.b16 %v609_v4 }
  0xe8   : > { %v1992_v6 = vpop.f32.mrf.mxu2 }
  0xe9   : > { %v614_v0 = vpack.c.bf16 %v1992_v6, %v1992_v6 }
  0xea   : > { %v437_v9 = vpop.f32.mrf.mxu0 }
  0xeb   : > { %v581_v56 = vpack.c.bf16 %v437_v9, %v437_v9  ;;  %v724_v9 = vunpack.c.l.b16 %v580_v23 }
  0xed   : > { %v725_v10 = vunpack.c.l.b16 %v581_v56 }
  0xf0   : > { %v1998_v15 = vpop.f32.mrf.mxu2 }
  0xf1   : > { %v615_v23 = vpack.c.bf16 %v1998_v15, %v1998_v15 }
  0xf2   : > { %v440_v19 = vpop.f32.mrf.mxu0 }
  0xf3   : > { %v582_v50 = vpack.c.bf16 %v440_v19, %v440_v19  ;;  %v735_v19 = vpack.c.b16 %v725_v10, %v724_v9  ;;  %v2089_v10 = vunpack.c.l.b16 %v614_v0 }
  0xf5   : > { %1509 = vmatmul.msk.bf16.gmra.mxu0 %vm304_vm0, %v280_v18  ;;  %1526 = vmatmul.msk.bf16.gmra.mxu2 %vm304_vm0, %v297_v20  ;;  %v726_v61 = vunpack.c.l.b16 %v582_v50  ;;  %v723_v18 = vunpack.c.l.b16 %v579_v5  ;;  %v722_v20 = vunpack.c.l.b16 %v578_v12 }
  0xf7   : > { %v734_v33 = vpack.c.b16 %v723_v18, %v722_v20 }
  0xf8   : > { %v2006_v25 = vpop.f32.mrf.mxu2 }
  0xfa   : > { %v442_v26 = vpop.f32.mrf.mxu0 }
  0xfb   : > { %v583_v48 = vpack.c.bf16 %v442_v26, %v442_v26  ;;  %v2043_v26 = vunpack.c.l.b16 %v608_v14 }
  0xfd   : > { %v727_v59 = vunpack.c.l.b16 %v583_v48  ;;  %v1122_v38 = vpack.c.b16 %v2045_v30, %v2043_v26  ;;  %v1767_v26 = vld [vmem:[%s2162_s4 + $0x60] sm:$0xff] }
  0xff   : > { %v736_v11 = vpack.c.b16 %v727_v59, %v726_v61 }
 0x100   : > { %v2016_v35 = vpop.f32.mrf.mxu2 }
 0x101   : > { %v617_v20 = vpack.c.bf16 %v2016_v35, %v2016_v35 }
 0x102   : > { %v445_v39 = vpop.f32.mrf.mxu0 }
 0x103   : > { %v584_v40 = vpack.c.bf16 %v445_v39, %v445_v39 }
 0x105   : > { %1510 = vmatmul.msk.bf16.gmra.mxu0 %vm304_vm0, %v281_v36  ;;  %v728_v51 = vunpack.c.l.b16 %v584_v40 }
 0x108   : > { %v2023_v41 = vpop.f32.mrf.mxu2 }
 0x109   : > { %v618_v35 = vpack.c.bf16 %v2023_v41, %v2023_v41 }
 0x10a   : > { %v447_v42 = vpop.f32.mrf.mxu0 }
 0x10b   : > { %v585_v49 = vpack.c.bf16 %v447_v42, %v447_v42 }
 0x10d   : > { %v729_v54 = vunpack.c.l.b16 %v585_v49 }
 0x10f   : > { %v737_v60 = vpack.c.b16 %v729_v54, %v728_v51  ;;  %v2077_v54 = vunpack.c.l.b16 %v613_v16 }
 0x110   : > { %v2031_v63 = vpop.f32.mrf.mxu2 }
 0x111   : > { %746 = vmatpush.bf16.msra.mxu1 %v737_v60 }
 0x112   : > { %v450_v3 = vpop.f32.mrf.mxu0 }
 0x113   : > { %v586_v21 = vpack.c.bf16 %v450_v3, %v450_v3 }
 0x115   : > { %747 = vmatpush.bf16.msra.mxu1 %v736_v11  ;;  %v908_v36 = vunpack.c.l.b16 %v586_v21  ;;  %v2091_v11 = vunpack.c.l.b16 %v615_v23 }
 0x117   : > { %v1125_v6 = vpack.c.b16 %v2091_v11, %v2089_v10  ;;  %v1762_v10 = vld [vmem:[%s2162_s4 + $0x38] sm:$0xff]  ;;  %v1763_v11 = vld [vmem:[%s2162_s4 + $0x40] sm:$0xff] }
 0x118   : > { %v2041_v24 = vpop.f32.mrf.mxu2 }
 0x119   : > { %748 = vmatpush.bf16.msra.mxu1 %v735_v19  ;;  %v616_v19 = vpack.c.bf16 %v2006_v25, %v2006_v25 }
 0x11a   : > { %v452_v58 = vpop.f32.mrf.mxu0 }
 0x11b   : > { %v587_v55 = vpack.c.bf16 %v452_v58, %v452_v58 }
 0x11d   : > { %v909_v39 = vunpack.c.l.b16 %v587_v55  ;;  %749 = vmatpush.bf16.msra.mxu1 %v734_v33  ;;  %v2107_v55 = vunpack.c.l.b16 %v616_v19  ;;  %v2109_v33 = vunpack.c.l.b16 %v617_v20 }
 0x11f   : > { %v2047_v28 = vpack.c.b16 %v909_v39, %v908_v36  ;;  %v234_v36 = vld [vmem:[%s1858_s26 + $0x100] sm:$0xff]  ;;  %v235_v39 = vld [vmem:[%s1858_s26 + $0x108] sm:$0xff] }
 0x120   : > { %v2051_v62 = vpop.f32.mrf.mxu2 }
 0x121   : > { %750 = vmatpush.bf16.msra.mxu1 %v733_v52  ;;  %v2075_v52 = vunpack.c.l.b16 %v612_v32 }
 0x122   : > { %v455_v8 = vpop.f32.mrf.mxu0 }
 0x123   : > { %v588_v40 = vpack.c.bf16 %v455_v8, %v455_v8  ;;  %v1124_v59 = vpack.c.b16 %v2077_v54, %v2075_v52  ;;  %v282_v8 = vpack.c.bf16 %v235_v39, %v234_v36  ;;  %v1766_v52 = vld [vmem:[%s2162_s4 + $0x58] sm:$0xff]  ;;  %v1760_v54 = vld [vmem:[%s2162_s4 + $0x28] sm:$0xff] }
 0x125   : > { %751 = vmatpush.bf16.msra.mxu1 %v732_v37  ;;  %v910_v50 = vunpack.c.l.b16 %v588_v40  ;;  %v1126_v40 = vpack.c.b16 %v2109_v33, %v2107_v55  ;;  %1511 = vmatmul.msk.bf16.gmra.mxu0 %vm304_vm0, %v282_v8  ;;  %v1765_v55 = vld [vmem:[%s2162_s4 + $0x50] sm:$0xff] }
 0x128   : > { %v2059_v42 = vpop.f32.mrf.mxu2 }
 0x129   : > { %752 = vmatpush.bf16.msra.mxu1 %v731_v22  ;;  %v622_v41 = vpack.c.bf16 %v2059_v42, %v2059_v42 }
 0x12a   : > { %v457_v48 = vpop.f32.mrf.mxu0 }
 0x12b   : > { %v589_v49 = vpack.c.bf16 %v457_v48, %v457_v48  ;;  %v2146_v0 = vunpack.c.l.b16 %v622_v41 }
 0x12d   : > { %v911_v51 = vunpack.c.l.b16 %v589_v49  ;;  %753 = vmatpush.bf16.msra.mxu1 %v730_v7  ;;  %v619_v49 = vpack.c.bf16 %v2031_v63, %v2031_v63 }
 0x12f   : > { %v2067_v46 = vpack.c.b16 %v911_v51, %v910_v50  ;;  %v2126_v32 = vunpack.c.l.b16 %v619_v49 }
 0x130   : > { %v2069_v47 = vpop.f32.mrf.mxu2 }
 0x131   : > { %v623_v63 = vpack.c.bf16 %v2069_v47, %v2069_v47 }
 0x132   : > { %v460_v31 = vpop.f32.mrf.mxu0 }
 0x133   : > { %v590_v17 = vpack.c.bf16 %v460_v31, %v460_v31  ;;  %v2124_v31 = vunpack.c.l.b16 %v618_v35  ;;  %v2148_v42 = vunpack.c.l.b16 %v623_v63 }
 0x135   : > { %v912_v2 = vunpack.c.l.b16 %v590_v17 }
 0x138   : > { %v545_v22 = vpop.f32.mrf.mxu2 }
 0x139   : > { %v624_v16 = vpack.c.bf16 %v545_v22, %v545_v22  ;;  %v620_v22 = vpack.c.bf16 %v2041_v24, %v2041_v24 }
 0x13a   : > { %v462_v37 = vpop.f32.mrf.mxu0 }
 0x13b   : > { %v591_v1 = vpack.c.bf16 %v462_v37, %v462_v37  ;;  %v1314_v37 = vpack.c.b16 %v2126_v32, %v2124_v31  ;;  %v2153_v23 = vunpack.c.l.b16 %v620_v22  ;;  %v610_v31 = vpack.c.bf16 %v1962_v43, %v1962_v43  ;;  %v1779_v32 = vld [vmem:[%s2162_s4 + $0xc0] sm:$0xff] }
 0x13d   : > { %v913_v7 = vunpack.c.l.b16 %v591_v1  ;;  %v2136_v1 = vunpack.c.l.b16 %v624_v16 }
 0x13f   : > { %v2079_v56 = vpack.c.b16 %v913_v7, %v912_v2 }
 0x140   : > { %v547_v60 = vpop.f32.mrf.mxu2 }
 0x141   : > { %v625_v17 = vpack.c.bf16 %v547_v60, %v547_v60  ;;  %v621_v60 = vpack.c.bf16 %v2051_v62, %v2051_v62  ;;  %v1755_v62 = vld [vmem:[%s2162_s4] sm:$0xff] }
 0x142   : > { %v465_v57 = vpop.f32.mrf.mxu0  ;;  %754 = vmatmul.bf16.vlgmr.msra.gmra.mxu1 %v1755_v62 }
 0x143   : > { %v592_v61 = vpack.c.bf16 %v465_v57, %v465_v57  ;;  %v2138_v2 = vunpack.c.l.b16 %v625_v17 }
 0x145   : > { %v914_v9 = vunpack.c.l.b16 %v592_v61  ;;  %v1317_v47 = vpack.c.b16 %v2138_v2, %v2136_v1  ;;  %v2155_v61 = vunpack.c.l.b16 %v621_v60 }
 0x148   : > { %v2087_v3 = vpop.f32.mrf.mxu2 }
 0x149   : > { %v626_v2 = vpack.c.bf16 %v2087_v3, %v2087_v3  ;;  %v1756_v3 = vld [vmem:[%s2162_s4 + $0x8] sm:$0xff] }
 0x14a   : > { %v467_v5 = vpop.f32.mrf.mxu0 }
 0x14b   : > { %v593_v12 = vpack.c.bf16 %v467_v5, %v467_v5 }
 0x14d   : > { %v915_v14 = vunpack.c.l.b16 %v593_v12  ;;  %v1316_v12 = vpack.c.b16 %v2148_v42, %v2146_v0 }
 0x14f   : > { %v2093_v4 = vpack.c.b16 %v915_v14, %v914_v9  ;;  %v1315_v9 = vpack.c.b16 %v2155_v61, %v2153_v23 }
 0x150   : > { %v2097_v18 = vpop.f32.mrf.mxu2 }
 0x151   : > { %v627_v22 = vpack.c.bf16 %v2097_v18, %v2097_v18 }
 0x152   : > { %v2099_v15 = vpop.f32.mrf.mxu0  ;;  %759 = vmatmul.bf16.gmra.mxu1 %v1756_v3 }
 0x153   : > { %v1307_v61 = vunpack.c.l.b16 %v627_v22 }
 0x158   : > { %v555_v21 = vpop.f32.mrf.mxu2 }
 0x159   : > { %v628_v49 = vpack.c.bf16 %v555_v21, %v555_v21 }
 0x15a   : > { %v2105_v58 = vpop.f32.mrf.mxu0 }
 0x15b   : > { %v1308_v60 = vunpack.c.l.b16 %v628_v49 }
 0x160   : > { %v557_v25 = vpop.f32.mrf.mxu2 }
 0x161   : > { %v629_v16 = vpack.c.bf16 %v557_v25, %v557_v25  ;;  %v1306_v25 = vunpack.c.l.b16 %v626_v2 }
 0x162   : > { %v2116_v48 = vpop.f32.mrf.mxu0 }
 0x168   : > { %v560_v50 = vpop.f32.mrf.mxu2 }
 0x169   : > { %v630_v19 = vpack.c.bf16 %v560_v50, %v560_v50  ;;  %v1309_v50 = vunpack.c.l.b16 %v629_v16 }
 0x16a   : > { %v2122_v51 = vpop.f32.mrf.mxu0 }
 0x16b   : > { %v1310_v17 = vunpack.c.l.b16 %v630_v19  ;;  %v597_v18 = vpack.c.bf16 %v2122_v51, %v2122_v51  ;;  %v594_v51 = vpack.c.bf16 %v2099_v15, %v2099_v15  ;;  %v1764_v15 = vld [vmem:[%s2162_s4 + $0x48] sm:$0xff] }
 0x170   : > { %v562_v7 = vpop.f32.mrf.mxu2 }
 0x171   : > { %v631_v20 = vpack.c.bf16 %v562_v7, %v562_v7 }
 0x172   : > { %v480_v57 = vpop.f32.mrf.mxu0 }
 0x173   : > { %v1311_v41 = vunpack.c.l.b16 %v631_v20  ;;  %v598_v62 = vpack.c.bf16 %v480_v57, %v480_v57  ;;  %v595_v57 = vpack.c.bf16 %v2105_v58, %v2105_v58  ;;  %v1757_v58 = vld [vmem:[%s2162_s4 + $0x10] sm:$0xff] }
 0x174   : > { %764 = vmatmul.bf16.gmra.mxu1 %v1757_v58 }
 0x175   : > { %v1320_v7 = vpack.c.b16 %v1311_v41, %v1310_v17  ;;  %v917_v17 = vunpack.c.l.b16 %v595_v57 }
 0x178   : > { %v565_v5 = vpop.f32.mrf.mxu2 }
 0x179   : > { %v632_v14 = vpack.c.bf16 %v565_v5, %v565_v5  ;;  %v1319_v5 = vpack.c.b16 %v1309_v50, %v1308_v60  ;;  %v1771_v50 = vld [vmem:[%s2162_s4 + $0x80] sm:$0xff] }
 0x17a   : > { %v482_v24 = vpop.f32.mrf.mxu0 }
 0x17b   : > { %v1312_v39 = vunpack.c.l.b16 %v632_v14  ;;  %v599_v23 = vpack.c.bf16 %v482_v24, %v482_v24  ;;  %v920_v24 = vunpack.c.l.b16 %v598_v62 }
 0x17d   : > { %v921_v20 = vunpack.c.l.b16 %v599_v23 }
 0x17f   : > { %v930_v49 = vpack.c.b16 %v921_v20, %v920_v24 }
 0x180   : > { %v567_v36 = vpop.f32.mrf.mxu2 }
 0x181   : > { %v633_v8 = vpack.c.bf16 %v567_v36, %v567_v36 }
 0x182   : > { %v485_v35 = vpop.f32.mrf.mxu0 }
 0x183   : > { %v1313_v63 = vunpack.c.l.b16 %v633_v8  ;;  %v600_v0 = vpack.c.bf16 %v485_v35, %v485_v35  ;;  %v596_v8 = vpack.c.bf16 %v2116_v48, %v2116_v48  ;;  %v919_v35 = vunpack.c.l.b16 %v597_v18 }
 0x184   : > { %v916_v48 = vunpack.c.l.b16 %v594_v51 }
 0x185   : > { %v1321_v1 = vpack.c.b16 %v1313_v63, %v1312_v39  ;;  %v922_v14 = vunpack.c.l.b16 %v600_v0  ;;  %v1318_v39 = vpack.c.b16 %v1307_v61, %v1306_v25  ;;  %v918_v16 = vunpack.c.l.b16 %v596_v8  ;;  %v1772_v25 = vld [vmem:[%s2162_s4 + $0x88] sm:$0xff]  ;;  %v1782_v61 = vld [vmem:[%s2162_s4 + $0xd8] sm:$0xff]  ;;  %v1783_v8 = vld [vmem:[%s2162_s4 + $0xe0] sm:$0xff] }
 0x186   : > { %v928_v63 = vpack.c.b16 %v917_v17, %v916_v48  ;;  %v1774_v48 = vld [vmem:[%s2162_s4 + $0x98] sm:$0xff] }
 0x187   : > { %1330 = vmatpush.bf16.msrb.mxu1 %v1321_v1  ;;  %v929_v41 = vpack.c.b16 %v919_v35, %v918_v16 }
 0x18a   : > { %v487_v42 = vpop.f32.mrf.mxu0 }
 0x18b   : > { %v601_v21 = vpack.c.bf16 %v487_v42, %v487_v42  ;;  %1331 = vmatpush.bf16.msrb.mxu1 %v1320_v7  ;;  %v1781_v7 = vld [vmem:[%s2162_s4 + $0xd0] sm:$0xff] }
 0x18d   : > { %v923_v19 = vunpack.c.l.b16 %v601_v21 }
 0x18f   : > { %v931_v36 = vpack.c.b16 %v923_v19, %v922_v14  ;;  %1332 = vmatpush.bf16.msrb.mxu1 %v1319_v5 }
 0x191   : > { %940 = vmatpush.bf16.msrb.mxu2 %v931_v36  ;;  %1789 = vmatpush.bf16.msra.mxu3 %v931_v36 }
 0x193   : > { %1333 = vmatpush.bf16.msrb.mxu1 %v1318_v39  ;;  %v1773_v39 = vld [vmem:[%s2162_s4 + $0x90] sm:$0xff] }
 0x195   : > { %941 = vmatpush.bf16.msrb.mxu2 %v930_v49  ;;  %1790 = vmatpush.bf16.msra.mxu3 %v930_v49 }
 0x197   : > { %1334 = vmatpush.bf16.msrb.mxu1 %v1317_v47 }
 0x199   : > { %942 = vmatpush.bf16.msrb.mxu2 %v929_v41  ;;  %1791 = vmatpush.bf16.msra.mxu3 %v929_v41 }
 0x19b   : > { %1335 = vmatpush.bf16.msrb.mxu1 %v1316_v12  ;;  %v1770_v12 = vld [vmem:[%s2162_s4 + $0x78] sm:$0xff] }
 0x19d   : > { %943 = vmatpush.bf16.msrb.mxu2 %v928_v63  ;;  %1792 = vmatpush.bf16.msra.mxu3 %v928_v63  ;;  %v1784_v63 = vld [vmem:[%s2162_s4 + $0xe8] sm:$0xff] }
 0x19f   : > { %1336 = vmatpush.bf16.msrb.mxu1 %v1315_v9  ;;  %v1780_v9 = vld [vmem:[%s2162_s4 + $0xc8] sm:$0xff] }
 0x1a1   : > { %944 = vmatpush.bf16.msrb.mxu2 %v2093_v4  ;;  %1793 = vmatpush.bf16.msra.mxu3 %v2093_v4  ;;  %v1758_v4 = vld [vmem:[%s2162_s4 + $0x18] sm:$0xff] }
 0x1a2   : > { %769 = vmatmul.bf16.gmra.mxu1 %v1758_v4  ;;  %v490_v30 = vpop.f32.mrf.mxu0 }
 0x1a3   : > { %1337 = vmatpush.bf16.msrb.mxu1 %v1314_v37  ;;  %v602_v44 = vpack.c.bf16 %v490_v30, %v490_v30 }
 0x1a5   : > { %945 = vmatpush.bf16.msrb.mxu2 %v2079_v56  ;;  %1794 = vmatpush.bf16.msra.mxu3 %v2079_v56  ;;  %v611_v56 = vpack.c.bf16 %v1974_v53, %v1974_v53  ;;  %v1759_v53 = vld [vmem:[%s2162_s4 + $0x20] sm:$0xff] }
 0x1a9   : > { %946 = vmatpush.bf16.msrb.mxu2 %v2067_v46  ;;  %1795 = vmatpush.bf16.msra.mxu3 %v2067_v46  ;;  %v1112_v46 = vunpack.c.l.b16 %v611_v56 }
 0x1aa   : > { %v492_v45 = vpop.f32.mrf.mxu0 }
 0x1ab   : > { %v603_v27 = vpack.c.bf16 %v492_v45, %v492_v45 }
 0x1ad   : > { %947 = vmatpush.bf16.msrb.mxu2 %v2047_v28  ;;  %1796 = vmatpush.bf16.msra.mxu3 %v2047_v28  ;;  %v1111_v28 = vunpack.c.l.b16 %v610_v31  ;;  %v1104_v29 = vunpack.c.l.b16 %v603_v27  ;;  %v1776_v27 = vld [vmem:[%s2162_s4 + $0xa8] sm:$0xff] }
 0x1af   : > { %v1123_v43 = vpack.c.b16 %v1112_v46, %v1111_v28 }
 0x1b0   : > { %953 = vmatmul.bf16.vlgmr.msra.gmra.mxu3 %v1764_v15  ;;  %948 = vmatmul.bf16.vlgmr.msrb.gmra.mxu2 %v1763_v11 }
 0x1b1   : > { %1135 = vmatpush.bf16.msrb.mxu3 %v1126_v40 }
 0x1b2   : > { %774 = vmatmul.bf16.gmra.mxu1 %v1759_v53  ;;  %v1785_v53 = vld [vmem:[%s2162_s4 + $0xf0] sm:$0xff] }
 0x1b5   : > { %1136 = vmatpush.bf16.msrb.mxu3 %v1125_v6  ;;  %v1769_v6 = vld [vmem:[%s2162_s4 + $0x70] sm:$0xff] }
 0x1b9   : > { %1137 = vmatpush.bf16.msrb.mxu3 %v1124_v59  ;;  %v1768_v59 = vld [vmem:[%s2162_s4 + $0x68] sm:$0xff] }
 0x1bd   : > { %1138 = vmatpush.bf16.msrb.mxu3 %v1123_v43 }
 0x1bf   : > { %v755_v33 = vpop.f32.mrf.mxu1 }
 0x1c0   : > { %958 = vmatmul.bf16.gmra.mxu3 %v1765_v55  ;;  %v795_v40 = vmax.f32 %v755_v33, 0.0  ;;  %v1775_v55 = vld [vmem:[%s2162_s4 + $0xa0] sm:$0xff] }
 0x1c1   : > { %1139 = vmatpush.bf16.msrb.mxu3 %v1122_v38  ;;  %v1761_v38 = vld [vmem:[%s2162_s4 + $0x30] sm:$0xff] }
 0x1c2   : > { %779 = vmatmul.bf16.gmra.mxu1 %v1760_v54  ;;  %811 = vst.msk [vmem:[%s2230_s8] sm:$0xff] %vm304_vm0, %v795_v40 }
 0x1c5   : > { %1140 = vmatpush.bf16.msrb.mxu3 %v1121_v13  ;;  %v1103_v13 = vunpack.c.l.b16 %v602_v44 }
 0x1c7   : > { %v757_v37 = vpop.f32.mrf.mxu1 }
 0x1c8   : > { %v796_v47 = vmax.f32 %v757_v37, 0.0  ;;  %v1777_v37 = vld [vmem:[%s2162_s4 + $0xb0] sm:$0xff] }
 0x1c9   : > { %1141 = vmatpush.bf16.msrb.mxu3 %v1120_v34  ;;  %v1119_v34 = vpack.c.b16 %v1104_v29, %v1103_v13  ;;  %v1786_v29 = vld [vmem:[%s2162_s4 + $0xf8] sm:$0xff] }
 0x1ca   : > { %812 = vst.msk [vmem:[%s2230_s8 + $0x8] sm:$0xff] %vm304_vm0, %v796_v47 }
 0x1cd   : > { %1142 = vmatpush.bf16.msrb.mxu3 %v1119_v34 }
 0x1cf   : > { %v760_v1 = vpop.f32.mrf.mxu1 }
 0x1d0   : > { %963 = vmatmul.bf16.gmra.mxu3 %v1766_v52  ;;  %v797_v2 = vmax.f32 %v760_v1, 0.0 }
 0x1d2   : > { %784 = vmatmul.bf16.gmra.mxu1 %v1761_v38  ;;  %813 = vst.msk [vmem:[%s2230_s8 + $0x10] sm:$0xff] %vm304_vm0, %v797_v2 }
 0x1d7   : > { %v762_v22 = vpop.f32.mrf.mxu1 }
 0x1d8   : > { %v798_v60 = vmax.f32 %v762_v22, 0.0 }
 0x1da   : > { %814 = vst.msk [vmem:[%s2230_s8 + $0x18] sm:$0xff] %vm304_vm0, %v798_v60 }
 0x1e0   : > { %968 = vmatmul.bf16.gmra.mxu3 %v1767_v26 }
 0x1e2   : > { %789 = vmatmul.bf16.gmra.mxu1 %v1762_v10 }
 0x1f0   : > { %973 = vmatmul.bf16.gmra.mxu3 %v1768_v59 }
 0x1f1   : > { %v765_v0 = vpop.f32.mrf.mxu1 }
 0x1f2   : > { %1338 = vmatmul.bf16.vlgmr.msrb.gmra.mxu1 %v1779_v32  ;;  %v799_v42 = vmax.f32 %v765_v0, 0.0  ;;  %v1778_v0 = vld [vmem:[%s2162_s4 + $0xb8] sm:$0xff] }
 0x1f4   : > { %815 = vst.msk [vmem:[%s2230_s8 + $0x20] sm:$0xff] %vm304_vm0, %v799_v42 }
 0x1f9   : > { %v767_v23 = vpop.f32.mrf.mxu1 }
 0x1fa   : > { %v800_v21 = vmax.f32 %v767_v23, 0.0 }
 0x1fc   : > { %816 = vst.msk [vmem:[%s2230_s8 + $0x28] sm:$0xff] %vm304_vm0, %v800_v21 }
 0x200   : > { %978 = vmatmul.bf16.gmra.mxu3 %v1769_v6 }
 0x202   : > { %1343 = vmatmul.bf16.gmra.mxu1 %v1780_v9 }
 0x210   : > { %983 = vmatmul.bf16.gmra.mxu3 %v1770_v12 }
 0x212   : > { %1348 = vmatmul.bf16.gmra.mxu1 %v1781_v7 }
 0x21f   : > { %v770_v5 = vpop.f32.mrf.mxu1 }
 0x220   : > { %1143 = vmatmul.bf16.vlgmr.msrb.gmra.mxu3 %v1771_v50  ;;  %v801_v62 = vmax.f32 %v770_v5, 0.0 }
 0x222   : > { %817 = vst.msk [vmem:[%s2230_s8 + $0x30] sm:$0xff] %vm304_vm0, %v801_v62  ;;  %1353 = vmatmul.bf16.gmra.mxu1 %v1782_v61 }
 0x227   : > { %v772_v3 = vpop.f32.mrf.mxu1 }
 0x228   : > { %v802_v18 = vmax.f32 %v772_v3, 0.0 }
 0x22a   : > { %818 = vst.msk [vmem:[%s2230_s8 + $0x38] sm:$0xff] %vm304_vm0, %v802_v18 }
 0x22f   : > { %v775_v24 = vpop.f32.mrf.mxu1 }
 0x230   : > { %1148 = vmatmul.bf16.gmra.mxu3 %v1772_v25  ;;  %v803_v57 = vmax.f32 %v775_v24, 0.0 }
 0x232   : > { %819 = vst.msk [vmem:[%s2230_s8 + $0x40] sm:$0xff] %vm304_vm0, %v803_v57  ;;  %1358 = vmatmul.bf16.gmra.mxu1 %v1783_v8 }
 0x233   : > { %v954_v14 = vpop.f32.mrf.mxu3  ;;  %v949_v47 = vpop.f32.mrf.mxu2 }
 0x234   : > { %v991_v19 = vmax.f32 %v954_v14, 0.0  ;;  %v989_v12 = vmax.f32 %v949_v47, 0.0 }
 0x236   : > { %1609 = vst.msk [vmem:[%s2230_s8 + $0x90] sm:$0xff] %vm304_vm0, %v991_v19 }
 0x237   : > { %v777_v51 = vpop.f32.mrf.mxu1  ;;  %1607 = vst.msk [vmem:[%s2230_s8 + $0x80] sm:$0xff] %vm304_vm0, %v989_v12 }
 0x238   : > { %v804_v16 = vmax.f32 %v777_v51, 0.0 }
 0x23a   : > { %820 = vst.msk [vmem:[%s2230_s8 + $0x48] sm:$0xff] %vm304_vm0, %v804_v16 }
 0x23b   : > { %v956_v20 = vpop.f32.mrf.mxu3  ;;  %v951_v22 = vpop.f32.mrf.mxu2 }
 0x23c   : > { %v992_v36 = vmax.f32 %v956_v20, 0.0  ;;  %v990_v60 = vmax.f32 %v951_v22, 0.0 }
 0x23e   : > { %1610 = vst.msk [vmem:[%s2230_s8 + $0x98] sm:$0xff] %vm304_vm0, %v992_v36 }
 0x23f   : > { %v780_v58 = vpop.f32.mrf.mxu1  ;;  %1608 = vst.msk [vmem:[%s2230_s8 + $0x88] sm:$0xff] %vm304_vm0, %v990_v60 }
 0x240   : > { %1153 = vmatmul.bf16.gmra.mxu3 %v1773_v39  ;;  %v805_v15 = vmax.f32 %v780_v58, 0.0 }
 0x242   : > { %821 = vst.msk [vmem:[%s2230_s8 + $0x50] sm:$0xff] %vm304_vm0, %v805_v15  ;;  %1363 = vmatmul.bf16.gmra.mxu1 %v1784_v63 }
 0x243   : > { %v959_v35 = vpop.f32.mrf.mxu3 }
 0x244   : > { %v993_v49 = vmax.f32 %v959_v35, 0.0 }
 0x246   : > { %1611 = vst.msk [vmem:[%s2230_s8 + $0xa0] sm:$0xff] %vm304_vm0, %v993_v49 }
 0x247   : > { %v782_v56 = vpop.f32.mrf.mxu1 }
 0x248   : > { %v806_v28 = vmax.f32 %v782_v56, 0.0 }
 0x24a   : > { %822 = vst.msk [vmem:[%s2230_s8 + $0x58] sm:$0xff] %vm304_vm0, %v806_v28 }
 0x24b   : > { %v961_v17 = vpop.f32.mrf.mxu3 }
 0x24c   : > { %v994_v41 = vmax.f32 %v961_v17, 0.0 }
 0x24e   : > { %1612 = vst.msk [vmem:[%s2230_s8 + $0xa8] sm:$0xff] %vm304_vm0, %v994_v41 }
 0x24f   : > { %v785_v52 = vpop.f32.mrf.mxu1 }
 0x250   : > { %1158 = vmatmul.bf16.gmra.mxu3 %v1774_v48  ;;  %v807_v54 = vmax.f32 %v785_v52, 0.0 }
 0x252   : > { %823 = vst.msk [vmem:[%s2230_s8 + $0x60] sm:$0xff] %vm304_vm0, %v807_v54  ;;  %1368 = vmatmul.bf16.gmra.mxu1 %v1785_v53 }
 0x253   : > { %v964_v4 = vpop.f32.mrf.mxu3 }
 0x254   : > { %v995_v31 = vmax.f32 %v964_v4, 0.0 }
 0x256   : > { %1613 = vst.msk [vmem:[%s2230_s8 + $0xb0] sm:$0xff] %vm304_vm0, %v995_v31 }
 0x257   : > { %v787_v38 = vpop.f32.mrf.mxu1 }
 0x258   : > { %v808_v44 = vmax.f32 %v787_v38, 0.0 }
 0x25a   : > { %824 = vst.msk [vmem:[%s2230_s8 + $0x68] sm:$0xff] %vm304_vm0, %v808_v44 }
 0x25b   : > { %v966_v46 = vpop.f32.mrf.mxu3 }
 0x25c   : > { %v996_v43 = vmax.f32 %v966_v46, 0.0 }
 0x25e   : > { %1614 = vst.msk [vmem:[%s2230_s8 + $0xb8] sm:$0xff] %vm304_vm0, %v996_v43 }
 0x25f   : > { %v790_v34 = vpop.f32.mrf.mxu1 }
 0x260   : > { %1163 = vmatmul.bf16.gmra.mxu3 %v1775_v55  ;;  %v809_v59 = vmax.f32 %v790_v34, 0.0 }
 0x262   : > { %825 = vst.msk [vmem:[%s2230_s8 + $0x70] sm:$0xff] %vm304_vm0, %v809_v59  ;;  %1373 = vmatmul.bf16.gmra.mxu1 %v1786_v29 }
 0x263   : > { %v969_v26 = vpop.f32.mrf.mxu3 }
 0x264   : > { %v997_v30 = vmax.f32 %v969_v26, 0.0 }
 0x266   : > { %1615 = vst.msk [vmem:[%s2230_s8 + $0xc0] sm:$0xff] %vm304_vm0, %v997_v30 }
 0x267   : > { %v792_v6 = vpop.f32.mrf.mxu1 }
 0x268   : > { %v810_v33 = vmax.f32 %v792_v6, 0.0 }
 0x26a   : > { %826 = vst.msk [vmem:[%s2230_s8 + $0x78] sm:$0xff] %vm304_vm0, %v810_v33 }
 0x26b   : > { %v971_v45 = vpop.f32.mrf.mxu3 }
 0x26c   : > { %v998_v13 = vmax.f32 %v971_v45, 0.0 }
 0x26e   : > { %1616 = vst.msk [vmem:[%s2230_s8 + $0xc8] sm:$0xff] %vm304_vm0, %v998_v13 }
 0x26f   : > { %v1339_v2 = vpop.f32.mrf.mxu1 }
 0x270   : > { %1168 = vmatmul.bf16.gmra.mxu3 %v1776_v27  ;;  %v1379_v14 = vmax.f32 %v1339_v2, 0.0 }
 0x272   : > { %1735 = vst.msk [vmem:[%s2230_s8 + $0x180] sm:$0xff] %vm304_vm0, %v1379_v14 }
 0x273   : > { %v974_v10 = vpop.f32.mrf.mxu3 }
 0x274   : > { %v999_v11 = vmax.f32 %v974_v10, 0.0 }
 0x276   : > { %1617 = vst.msk [vmem:[%s2230_s8 + $0xd0] sm:$0xff] %vm304_vm0, %v999_v11 }
 0x277   : > { %v1341_v42 = vpop.f32.mrf.mxu1 }
 0x278   : > { %v1380_v39 = vmax.f32 %v1341_v42, 0.0 }
 0x27a   : > { %1736 = vst.msk [vmem:[%s2230_s8 + $0x188] sm:$0xff] %vm304_vm0, %v1380_v39 }
 0x27b   : > { %v976_v40 = vpop.f32.mrf.mxu3 }
 0x27c   : > { %v1000_v32 = vmax.f32 %v976_v40, 0.0 }
 0x27e   : > { %1618 = vst.msk [vmem:[%s2230_s8 + $0xd8] sm:$0xff] %vm304_vm0, %v1000_v32 }
 0x27f   : > { %v1344_v25 = vpop.f32.mrf.mxu1 }
 0x280   : > { %1173 = vmatmul.bf16.gmra.mxu3 %v1777_v37  ;;  %v1381_v8 = vmax.f32 %v1344_v25, 0.0 }
 0x282   : > { %1737 = vst.msk [vmem:[%s2230_s8 + $0x190] sm:$0xff] %vm304_vm0, %v1381_v8 }
 0x283   : > { %v979_v9 = vpop.f32.mrf.mxu3 }
 0x284   : > { %v1001_v1 = vmax.f32 %v979_v9, 0.0 }
 0x286   : > { %1619 = vst.msk [vmem:[%s2230_s8 + $0xe0] sm:$0xff] %vm304_vm0, %v1001_v1 }
 0x287   : > { %v1346_v62 = vpop.f32.mrf.mxu1 }
 0x288   : > { %v1382_v16 = vmax.f32 %v1346_v62, 0.0 }
 0x28a   : > { %1738 = vst.msk [vmem:[%s2230_s8 + $0x198] sm:$0xff] %vm304_vm0, %v1382_v16 }
 0x28b   : > { %v981_v50 = vpop.f32.mrf.mxu3 }
 0x28c   : > { %v1002_v7 = vmax.f32 %v981_v50, 0.0 }
 0x28e   : > { %1620 = vst.msk [vmem:[%s2230_s8 + $0xe8] sm:$0xff] %vm304_vm0, %v1002_v7 }
 0x28f   : > { %v1349_v36 = vpop.f32.mrf.mxu1 }
 0x290   : > { %1178 = vmatmul.bf16.gmra.mxu3 %v1778_v0  ;;  %v1383_v41 = vmax.f32 %v1349_v36, 0.0 }
 0x292   : > { %1739 = vst.msk [vmem:[%s2230_s8 + $0x1a0] sm:$0xff] %vm304_vm0, %v1383_v41 }
 0x293   : > { %v984_v23 = vpop.f32.mrf.mxu3 }
 0x294   : > { %v1003_v21 = vmax.f32 %v984_v23, 0.0 }
 0x296   : > { %1621 = vst.msk [vmem:[%s2230_s8 + $0xf0] sm:$0xff] %vm304_vm0, %v1003_v21 }
 0x297   : > { %v1351_v35 = vpop.f32.mrf.mxu1 }
 0x298   : > { %v1384_v31 = vmax.f32 %v1351_v35, 0.0 }
 0x29a   : > { %1740 = vst.msk [vmem:[%s2230_s8 + $0x1a8] sm:$0xff] %vm304_vm0, %v1384_v31 }
 0x29b   : > { %v986_v61 = vpop.f32.mrf.mxu3 }
 0x29c   : > { %v1004_v5 = vmax.f32 %v986_v61, 0.0 }
 0x29e   : > { %1622 = vst.msk [vmem:[%s2230_s8 + $0xf8] sm:$0xff] %vm304_vm0, %v1004_v5 }
 0x29f   : > { %v1354_v17 = vpop.f32.mrf.mxu1 }
 0x2a0   : > { %v1385_v56 = vmax.f32 %v1354_v17, 0.0 }
 0x2a2   : > { %1741 = vst.msk [vmem:[%s2230_s8 + $0x1b0] sm:$0xff] %vm304_vm0, %v1385_v56 }
 0x2a3   : > { %v1144_v19 = vpop.f32.mrf.mxu3 }
 0x2a4   : > { %v1184_v3 = vmax.f32 %v1144_v19, 0.0 }
 0x2a6   : > { %1671 = vst.msk [vmem:[%s2230_s8 + $0x100] sm:$0xff] %vm304_vm0, %v1184_v3 }
 0x2a7   : > { %v1356_v58 = vpop.f32.mrf.mxu1 }
 0x2a8   : > { %v1386_v52 = vmax.f32 %v1356_v58, 0.0 }
 0x2aa   : > { %1742 = vst.msk [vmem:[%s2230_s8 + $0x1b8] sm:$0xff] %vm304_vm0, %v1386_v52 }
 0x2ab   : > { %v1146_v18 = vpop.f32.mrf.mxu3 }
 0x2ac   : > { %v1185_v20 = vmax.f32 %v1146_v18, 0.0 }
 0x2ae   : > { %1672 = vst.msk [vmem:[%s2230_s8 + $0x108] sm:$0xff] %vm304_vm0, %v1185_v20 }
 0x2af   : > { %v1359_v43 = vpop.f32.mrf.mxu1 }
 0x2b0   : > { %v1387_v26 = vmax.f32 %v1359_v43, 0.0 }
 0x2b2   : > { %1743 = vst.msk [vmem:[%s2230_s8 + $0x1c0] sm:$0xff] %vm304_vm0, %v1387_v26 }
 0x2b3   : > { %v1149_v24 = vpop.f32.mrf.mxu3 }
 0x2b4   : > { %v1186_v57 = vmax.f32 %v1149_v24, 0.0 }
 0x2b6   : > { %1673 = vst.msk [vmem:[%s2230_s8 + $0x110] sm:$0xff] %vm304_vm0, %v1186_v57 }
 0x2b7   : > { %v1361_v54 = vpop.f32.mrf.mxu1 }
 0x2b8   : > { %v1388_v27 = vmax.f32 %v1361_v54, 0.0 }
 0x2ba   : > { %1744 = vst.msk [vmem:[%s2230_s8 + $0x1c8] sm:$0xff] %vm304_vm0, %v1388_v27 }
 0x2bb   : > { %v1151_v49 = vpop.f32.mrf.mxu3 }
 0x2bc   : > { %v1187_v51 = vmax.f32 %v1151_v49, 0.0 }
 0x2be   : > { %1674 = vst.msk [vmem:[%s2230_s8 + $0x118] sm:$0xff] %vm304_vm0, %v1187_v51 }
 0x2bf   : > { %v1364_v44 = vpop.f32.mrf.mxu1 }
 0x2c0   : > { %v1389_v34 = vmax.f32 %v1364_v44, 0.0 }
 0x2c2   : > { %1745 = vst.msk [vmem:[%s2230_s8 + $0x1d0] sm:$0xff] %vm304_vm0, %v1389_v34 }
 0x2c3   : > { %v1154_v48 = vpop.f32.mrf.mxu3 }
 0x2c4   : > { %v1188_v63 = vmax.f32 %v1154_v48, 0.0 }
 0x2c6   : > { %1675 = vst.msk [vmem:[%s2230_s8 + $0x120] sm:$0xff] %vm304_vm0, %v1188_v63 }
 0x2c7   : > { %v1366_v29 = vpop.f32.mrf.mxu1 }
 0x2c8   : > { %v1390_v40 = vmax.f32 %v1366_v29, 0.0 }
 0x2ca   : > { %1746 = vst.msk [vmem:[%s2230_s8 + $0x1d8] sm:$0xff] %vm304_vm0, %v1390_v40 }
 0x2cb   : > { %v1156_v15 = vpop.f32.mrf.mxu3 }
 0x2cc   : > { %v1189_v4 = vmax.f32 %v1156_v15, 0.0 }
 0x2ce   : > { %1676 = vst.msk [vmem:[%s2230_s8 + $0x128] sm:$0xff] %vm304_vm0, %v1189_v4 }
 0x2cf   : > { %v1369_v33 = vpop.f32.mrf.mxu1 }
 0x2d0   : > { %v1391_v32 = vmax.f32 %v1369_v33, 0.0 }
 0x2d2   : > { %1747 = vst.msk [vmem:[%s2230_s8 + $0x1e0] sm:$0xff] %vm304_vm0, %v1391_v32 }
 0x2d3   : > { %v1159_v28 = vpop.f32.mrf.mxu3 }
 0x2d4   : > { %v1190_v46 = vmax.f32 %v1159_v28, 0.0 }
 0x2d6   : > { %1677 = vst.msk [vmem:[%s2230_s8 + $0x130] sm:$0xff] %vm304_vm0, %v1190_v46 }
 0x2d7   : > { %v1371_v12 = vpop.f32.mrf.mxu1 }
 0x2d8   : > { %v1392_v2 = vmax.f32 %v1371_v12, 0.0 }
 0x2da   : > { %1748 = vst.msk [vmem:[%s2230_s8 + $0x1e8] sm:$0xff] %vm304_vm0, %v1392_v2 }
 0x2db   : > { %v1161_v55 = vpop.f32.mrf.mxu3 }
 0x2dc   : > { %v1191_v53 = vmax.f32 %v1161_v55, 0.0 }
 0x2de   : > { %1678 = vst.msk [vmem:[%s2230_s8 + $0x138] sm:$0xff] %vm304_vm0, %v1191_v53 }
 0x2df   : > { %v1374_v22 = vpop.f32.mrf.mxu1 }
 0x2e0   : > { %v1393_v60 = vmax.f32 %v1374_v22, 0.0 }
 0x2e2   : > { %1749 = vst.msk [vmem:[%s2230_s8 + $0x1f0] sm:$0xff] %vm304_vm0, %v1393_v60 }
 0x2e3   : > { %v1164_v30 = vpop.f32.mrf.mxu3 }
 0x2e4   : > { %v1192_v38 = vmax.f32 %v1164_v30, 0.0 }
 0x2e6   : > { %1679 = vst.msk [vmem:[%s2230_s8 + $0x140] sm:$0xff] %vm304_vm0, %v1192_v38 }
 0x2e7   : > { %v1376_v0 = vpop.f32.mrf.mxu1 }
 0x2e8   : > { %v1394_v21 = vmax.f32 %v1376_v0, 0.0 }
 0x2ea   : > { %1750 = vst.msk [vmem:[%s2230_s8 + $0x1f8] sm:$0xff] %vm304_vm0, %v1394_v21 }
 0x2eb   : > { %v1166_v45 = vpop.f32.mrf.mxu3 }
 0x2ec   : > { %v1193_v13 = vmax.f32 %v1166_v45, 0.0 }
 0x2ee   : > { %1680 = vst.msk [vmem:[%s2230_s8 + $0x148] sm:$0xff] %vm304_vm0, %v1193_v13 }
 0x2f3   : > { %v1169_v59 = vpop.f32.mrf.mxu3 }
 0x2f4   : > { %v1194_v10 = vmax.f32 %v1169_v59, 0.0 }
 0x2f6   : > { %1681 = vst.msk [vmem:[%s2230_s8 + $0x150] sm:$0xff] %vm304_vm0, %v1194_v10 }
 0x2fb   : > { %v1171_v11 = vpop.f32.mrf.mxu3 }
 0x2fc   : > { %v1195_v6 = vmax.f32 %v1171_v11, 0.0 }
 0x2fe   : > { %1682 = vst.msk [vmem:[%s2230_s8 + $0x158] sm:$0xff] %vm304_vm0, %v1195_v6 }
 0x303   : > { %v1174_v37 = vpop.f32.mrf.mxu3 }
 0x304   : > { %v1196_v47 = vmax.f32 %v1174_v37, 0.0 }
 0x306   : > { %1683 = vst.msk [vmem:[%s2230_s8 + $0x160] sm:$0xff] %vm304_vm0, %v1196_v47 }
 0x30b   : > { %v1176_v9 = vpop.f32.mrf.mxu3 }
 0x30c   : > { %v1197_v1 = vmax.f32 %v1176_v9, 0.0 }
 0x30e   : > { %1684 = vst.msk [vmem:[%s2230_s8 + $0x168] sm:$0xff] %vm304_vm0, %v1197_v1 }
 0x313   : > { %v1179_v50 = vpop.f32.mrf.mxu3 }
 0x314   : > { %v1198_v7 = vmax.f32 %v1179_v50, 0.0 }
 0x316   : > { %1685 = vst.msk [vmem:[%s2230_s8 + $0x170] sm:$0xff] %vm304_vm0, %v1198_v7 }
 0x31b   : > { %v1181_v42 = vpop.f32.mrf.mxu3 }
 0x31c   : > { %v1199_v23 = vmax.f32 %v1181_v42, 0.0 }
 0x31e   : > { %1686 = vst.msk [vmem:[%s2230_s8 + $0x178] sm:$0xff] %vm304_vm0, %v1199_v23 }
 0x31f PF: > { %s13_s12 = sadd.s32 1, %s1811_s12  }
 0x320   : > { %p10_p5 = scmp.ge.s32.totalorder %s13_s12, 4  }
 0x322   :  { %12 = sbr.rel (!%p10_p5) target bundleno = 1 (0x1), region = 71 }

</bundles_post_ra>
